<compile_context>
chip_gen: v5e
topology: v5e:2x2
jax: 0.10.0
libtpu: 0.0.40
codegen_flags: <defaults>
</compile_context>

<pallas_src>
import functools

import jax
import jax.numpy as jnp
from jax.experimental import pallas as pl
from jax.experimental.pallas import tpu as pltpu

TM_MAX = 512            # row tile upper bound (256-512 amortizes per-step pipeline overhead)
MOMENTUM_M = 0.999      # config.momentum_aux_m
LOSS_AUX_W = 1.0        # config.loss_aux_weight
INIT_RANGE = 0.02       # config.initializer_range

# MXU operand dtype: bf16 hits MXU peak on v6e/v7x (accumulation stays f32).
# Set to jnp.float32 on v5e if exact-f32 matmuls are preferred; elementwise math is f32 always.
MATMUL_DTYPE = jnp.bfloat16


def _round_up(x, m):
    return ((x + m - 1) // m) * m


def _pick_tiling(m_rows, h):
    """Row tile TM and padded row count.  Big tiles feed the MXU; small M -> one tile."""
    # Cap so a single f32 (tm, H) activation tile stays <= ~2 MiB even for large hidden.
    tm_cap = max(8, min(TM_MAX, ((2 << 20) // (h * 4)) // 8 * 8))
    if m_rows <= tm_cap:
        tm = _round_up(max(m_rows, 8), 8)
        return tm, tm
    return tm_cap, _round_up(m_rows, tm_cap)


# ----------------------------------------------------------------------------
# Fused kernel: q-MLP + k-MLP + mask + per-tile (8, H) partial sums of ((q-k)*m)^2
# ----------------------------------------------------------------------------
def _fused_aux_kernel(xq_ref, xk_ref, mask_ref,
                      wq1_ref, bq1_ref, wq2_ref, bq2_ref,
                      wk1_ref, bk1_ref, wk2_ref, bk2_ref,
                      *out_refs, tm, h, with_proj):
    if with_proj:
        qout_ref, kout_ref, psum_ref = out_refs
    else:
        (psum_ref,) = out_refs

    def mlp(x_f32, w1_ref, b1_ref, w2_ref, b2_ref):
        # bf16 MXU operands, f32 accumulate; bias/ReLU in f32 (v5e VPU has no bf16).
        hid = jnp.dot(x_f32.astype(MATMUL_DTYPE), w1_ref[...],
                      preferred_element_type=jnp.float32) + b1_ref[...]
        hid = jnp.maximum(hid, 0.0)
        return jnp.dot(hid.astype(MATMUL_DTYPE), w2_ref[...],
                       preferred_element_type=jnp.float32) + b2_ref[...]

    q = mlp(xq_ref[...].astype(jnp.float32), wq1_ref, bq1_ref, wq2_ref, bq2_ref)
    k = mlp(xk_ref[...].astype(jnp.float32), wk1_ref, bk1_ref, wk2_ref, bk2_ref)

    if with_proj:  # debug/verification path only; default path skips this HBM writeback
        qout_ref[...] = q.astype(qout_ref.dtype)
        kout_ref[...] = k.astype(kout_ref.dtype)

    m = mask_ref[...].astype(jnp.float32)          # (tm, 1); padded rows carry mask 0
    d = (q - k) * m                                # (tm, H)
    dd = d * d

    # Per-tile partial sums as pure vreg (VPU) adds; the scalar reduce happens once,
    # outside the kernel, over the tiny (grid, 8, H) partials slab.
    partial = dd[0:8, :]
    for j in range(1, tm // 8):                    # static unroll; aligned vreg slices
        partial = partial + dd[8 * j:8 * (j + 1), :]
    psum_ref[...] = partial.reshape(1, 8, h)


def fused_aux_projection_loss(xq2d, xk2d, mask_col, q_params, k_params, *, with_proj=False):
    """Runs both projection heads fused with the masked-MSE partial reduction.

    Returns (q_proj, k_proj, sum(((q-k)*mask)^2)); q_proj/k_proj are None unless
    with_proj=True (they are intermediates in the original forward, only the sum is needed).
    """
    M, H = xq2d.shape
    assert H % 128 == 0, "hidden size must be a multiple of 128 (lane width)"
    tm, m_pad = _pick_tiling(M, H)
    grid = m_pad // tm

    if m_pad != M:
        pad = ((0, m_pad - M), (0, 0))
        xq2d = jnp.pad(xq2d, pad)
        xk2d = jnp.pad(xk2d, pad)
        mask_col = jnp.pad(mask_col, pad)          # padded rows masked out of the loss

    wq1, bq1, wq2, bq2 = q_params
    wk1, bk1, wk2, bk2 = k_params
    to_mx = lambda w: w.astype(MATMUL_DTYPE)       # halves weight DMA on v6e/v7x
    row = lambda b: b.reshape(1, H).astype(jnp.float32)  # free layout op under jit

    x_spec = pl.BlockSpec((tm, H), lambda i: (i, 0))
    w_spec = pl.BlockSpec((H, H), lambda i: (0, 0))      # weights resident across steps
    b_spec = pl.BlockSpec((1, H), lambda i: (0, 0))
    psum_spec = pl.BlockSpec((1, 8, H), lambda i: (i, 0, 0))

    psum_shape = jax.ShapeDtypeStruct((grid, 8, H), jnp.float32)
    if with_proj:
        out_shape = (jax.ShapeDtypeStruct((m_pad, H), xq2d.dtype),
                     jax.ShapeDtypeStruct((m_pad, H), xk2d.dtype),
                     psum_shape)
        out_specs = (x_spec, x_spec, psum_spec)
    else:
        out_shape = (psum_shape,)
        out_specs = (psum_spec,)

    outs = pl.pallas_call(
        functools.partial(_fused_aux_kernel, tm=tm, h=H, with_proj=with_proj),
        out_shape=out_shape,
        grid_spec=pltpu.PrefetchScalarGridSpec(
            num_scalar_prefetch=0,
            grid=(grid,),
            in_specs=[
                x_spec, x_spec,
                pl.BlockSpec((tm, 1), lambda i: (i, 0)),
                w_spec, b_spec, w_spec, b_spec,
                w_spec, b_spec, w_spec, b_spec,
            ],
            out_specs=out_specs,
        ),
        compiler_params=pltpu.CompilerParams(
            # per-tile partials -> no cross-step accumulator, so the row axis is safe to
            # mark "parallel" (lets v7x's two TensorCores split the grid when M is large).
            dimension_semantics=("parallel",),
        ),
    )(xq2d, xk2d, mask_col,
      to_mx(wq1), row(bq1), to_mx(wq2), row(bq2),
      to_mx(wk1), row(bk1), to_mx(wk2), row(bk2))

    if with_proj:
        q_proj, k_proj, psums = outs
        return q_proj[:M], k_proj[:M], jnp.sum(psums)
    (psums,) = outs
    return None, None, jnp.sum(psums)              # one tiny XLA reduce over (grid, 8, H)


# ----------------------------------------------------------------------------
# Wrapper reproducing the aux-loss branch of Reasoner.forward
# ----------------------------------------------------------------------------
@functools.partial(jax.jit, static_argnames=("with_proj",))
def reasoner_aux_forward(video_feat, unmasked_video_feat, video_mask,
                         q_params, k_params, with_proj=False):
    B, L, H = video_feat.shape
    # TODO(synk): self.video_encoder / self.video_encoder_aux (CLIP_Position) undefined -> identity.
    video_embeddings = video_feat
    unmasked_video_embeddings = unmasked_video_feat

    # Momentum update of the aux (key) projection head (no_grad branch).
    # Plain jnp: XLA fuses these elementwise updates; per-param pallas_calls are all dispatch.
    k_new = jax.tree_util.tree_map(
        lambda pk, pq: pk * MOMENTUM_M + pq * (1.0 - MOMENTUM_M),
        tuple(k_params), tuple(q_params))

    mask_col = video_mask.reshape(B * L, 1).astype(jnp.float32)
    q_proj, k_proj, sumsq = fused_aux_projection_loss(
        video_embeddings.reshape(B * L, H),
        unmasked_video_embeddings.reshape(B * L, H),
        mask_col, q_params, k_new, with_proj=with_proj)

    aux_loss = LOSS_AUX_W * sumsq / jnp.sum(video_mask)

    # TODO(synk): decoder pass (_dec1_pass), relation_head, compensate_head, CE/hybrid losses
    #             depend on undefined submodules and are not translated.
    caption_loss = aux_loss
    if with_proj:
        return caption_loss, k_new, q_proj.reshape(B, L, H), k_proj.reshape(B, L, H)
    return caption_loss, k_new


# ----------------------------------------------------------------------------
# Pure-JAX references for correctness check
# ----------------------------------------------------------------------------
def _ref_mlp(x, w1, b1, w2, b2, dtype):
    h = jnp.dot(x.astype(dtype), w1.astype(dtype), preferred_element_type=jnp.float32) + b1
    h = jnp.maximum(h, 0.0)
    return jnp.dot(h.astype(dtype), w2.astype(dtype), preferred_element_type=jnp.float32) + b2


def _ref_forward(video_feat, unmasked_video_feat, video_mask, q_params, k_params, dtype):
    k_new = tuple(pk * MOMENTUM_M + pq * (1.0 - MOMENTUM_M)
                  for pk, pq in zip(k_params, q_params))
    q = _ref_mlp(video_feat, *q_params, dtype=dtype)
    k = _ref_mlp(unmasked_video_feat, *k_new, dtype=dtype)
    m = video_mask[..., None]
    loss = LOSS_AUX_W * jnp.sum(((q - k) * m) ** 2) / jnp.sum(video_mask)
    return loss, q, k


if __name__ == "__main__":
    key = jax.random.PRNGKey(0)
    B, NUM_EVENTS, H = 2, 3, 128
    L = 8 * NUM_EVENTS  # 24 frames

    k_vf, k_uvf, k_m, k_w1q, k_w2q, k_w1k, k_w2k = jax.random.split(key, 7)
    video_feat = jax.random.normal(k_vf, (B, L, H), dtype=jnp.float32)
    unmasked_video_feat = jax.random.normal(k_uvf, (B, L, H), dtype=jnp.float32)
    video_mask = (jax.random.uniform(k_m, (B, L)) > 0.2).astype(jnp.float32)

    # init_bert_weights: Linear weights ~ N(0, 0.02), biases = 0 (q and k heads independent,
    # since self.apply(init_bert_weights) runs after the copy in __init__).
    q_params = (
        INIT_RANGE * jax.random.normal(k_w1q, (H, H), dtype=jnp.float32),
        jnp.zeros((H,), jnp.float32),
        INIT_RANGE * jax.random.normal(k_w2q, (H, H), dtype=jnp.float32),
        jnp.zeros((H,), jnp.float32),
    )
    k_params = (
        INIT_RANGE * jax.random.normal(k_w1k, (H, H), dtype=jnp.float32),
        jnp.zeros((H,), jnp.float32),
        INIT_RANGE * jax.random.normal(k_w2k, (H, H), dtype=jnp.float32),
        jnp.zeros((H,), jnp.float32),
    )

    # ---- default (fast) path: loss-only, no projection writeback ----
    loss, k_new = reasoner_aux_forward(
        video_feat, unmasked_video_feat, video_mask, q_params, k_params)
    loss = jax.block_until_ready(loss)

    # Exact-path reference (same bf16 MXU operands, f32 accumulate).
    ref_loss_mx, ref_q, ref_k = _ref_forward(
        video_feat, unmasked_video_feat, video_mask, q_params, k_params, dtype=MATMUL_DTYPE)
    assert jnp.allclose(loss, ref_loss_mx, rtol=5e-3, atol=1e-5), (loss, ref_loss_mx)

    # Full-f32 semantic reference (original PyTorch math); loose tol covers bf16 operands.
    ref_loss_f32, _, _ = _ref_forward(
        video_feat, unmasked_video_feat, video_mask, q_params, k_params, dtype=jnp.float32)
    assert jnp.allclose(loss, ref_loss_f32, rtol=5e-2, atol=1e-2), (loss, ref_loss_f32)

    # ---- debug path: also materialize q/k projections for element-wise verification ----
    loss_dbg, _, q_proj, k_proj = reasoner_aux_forward(
        video_feat, unmasked_video_feat, video_mask, q_params, k_params, with_proj=True)
    jax.block_until_ready(loss_dbg)
    assert jnp.allclose(loss_dbg, ref_loss_mx, rtol=5e-3, atol=1e-5)
    assert jnp.allclose(q_proj, ref_q, rtol=5e-3, atol=5e-4)
    assert jnp.allclose(k_proj, ref_k, rtol=5e-3, atol=5e-4)

    # Momentum update sanity.
    ref_k_new = tuple(pk * MOMENTUM_M + pq * (1.0 - MOMENTUM_M)
                      for pk, pq in zip(k_params, q_params))
    for a, b in zip(k_new, ref_k_new):
        assert jnp.allclose(a, b, rtol=1e-6, atol=1e-7)

    print("KERNEL_OK")
</pallas_src>

<mosaic_0001>
module attributes {stable_mosaic.version = 11 : i64} {
  func.func @_fused_aux_kernel(%arg0: i32, %arg1: memref<48x128xf32, #tpu.memory_space<vmem>>, %arg2: memref<48x128xf32, #tpu.memory_space<vmem>>, %arg3: memref<48x1xf32, #tpu.memory_space<vmem>>, %arg4: memref<128x128xbf16, #tpu.memory_space<vmem>>, %arg5: memref<1x128xf32, #tpu.memory_space<vmem>>, %arg6: memref<128x128xbf16, #tpu.memory_space<vmem>>, %arg7: memref<1x128xf32, #tpu.memory_space<vmem>>, %arg8: memref<128x128xbf16, #tpu.memory_space<vmem>>, %arg9: memref<1x128xf32, #tpu.memory_space<vmem>>, %arg10: memref<128x128xbf16, #tpu.memory_space<vmem>>, %arg11: memref<1x128xf32, #tpu.memory_space<vmem>>, %arg12: memref<1x8x128xf32, #tpu.memory_space<vmem>>) attributes {dimension_semantics = [#tpu.dimension_semantics<parallel>], iteration_bounds = array<i64: 1>, scalar_prefetch = 0 : i64, scratch_operands = 0 : i64, tpu.core_type = #tpu.core_type<tc>, window_params = [{transform_indices = @transform_0, window_bounds = array<i64: 48, 128>}, {transform_indices = @transform_1, window_bounds = array<i64: 48, 128>}, {transform_indices = @transform_2, window_bounds = array<i64: 48, 1>}, {pipeline_mode = #tpu.pipeline_mode<synchronous>, transform_indices = @transform_3, window_bounds = array<i64: 128, 128>}, {pipeline_mode = #tpu.pipeline_mode<synchronous>, transform_indices = @transform_4, window_bounds = array<i64: 1, 128>}, {pipeline_mode = #tpu.pipeline_mode<synchronous>, transform_indices = @transform_5, window_bounds = array<i64: 128, 128>}, {pipeline_mode = #tpu.pipeline_mode<synchronous>, transform_indices = @transform_6, window_bounds = array<i64: 1, 128>}, {pipeline_mode = #tpu.pipeline_mode<synchronous>, transform_indices = @transform_7, window_bounds = array<i64: 128, 128>}, {pipeline_mode = #tpu.pipeline_mode<synchronous>, transform_indices = @transform_8, window_bounds = array<i64: 1, 128>}, {pipeline_mode = #tpu.pipeline_mode<synchronous>, transform_indices = @transform_9, window_bounds = array<i64: 128, 128>}, {pipeline_mode = #tpu.pipeline_mode<synchronous>, transform_indices = @transform_10, window_bounds = array<i64: 1, 128>}, {transform_indices = @transform_11, window_bounds = array<i64: 1, 8, 128>}]} {
    %c0 = arith.constant 0 : index
    %c0_0 = arith.constant 0 : index
    %0 = vector.load %arg1[%c0, %c0_0] : memref<48x128xf32, #tpu.memory_space<vmem>>, vector<48x128xf32>
    %1 = arith.truncf %0 : vector<48x128xf32> to vector<48x128xbf16>
    %c0_1 = arith.constant 0 : index
    %c0_2 = arith.constant 0 : index
    %2 = vector.load %arg4[%c0_1, %c0_2] : memref<128x128xbf16, #tpu.memory_space<vmem>>, vector<128x128xbf16>
    %cst = arith.constant dense<0.000000e+00> : vector<48x128xf32>
    %3 = tpu.matmul %1, %2, %cst {dimension_numbers = #tpu.dot_dimension_numbers<[1], [0], [0], [1], [0, 0, 1, 1], [], []>} : vector<48x128xbf16>, vector<128x128xbf16>, vector<48x128xf32> -> vector<48x128xf32>
    %c0_3 = arith.constant 0 : index
    %c0_4 = arith.constant 0 : index
    %4 = vector.load %arg5[%c0_3, %c0_4] : memref<1x128xf32, #tpu.memory_space<vmem>>, vector<1x128xf32>
    %5 = vector.broadcast %4 : vector<1x128xf32> to vector<48x128xf32>
    %6 = arith.addf %3, %5 : vector<48x128xf32>
    %cst_5 = arith.constant 0.000000e+00 : f32
    %7 = vector.broadcast %cst_5 : f32 to vector<48x128xf32>
    %8 = arith.maximumf %6, %7 : vector<48x128xf32>
    %9 = arith.truncf %8 : vector<48x128xf32> to vector<48x128xbf16>
    %c0_6 = arith.constant 0 : index
    %c0_7 = arith.constant 0 : index
    %10 = vector.load %arg6[%c0_6, %c0_7] : memref<128x128xbf16, #tpu.memory_space<vmem>>, vector<128x128xbf16>
    %cst_8 = arith.constant dense<0.000000e+00> : vector<48x128xf32>
    %11 = tpu.matmul %9, %10, %cst_8 {dimension_numbers = #tpu.dot_dimension_numbers<[1], [0], [0], [1], [0, 0, 1, 1], [], []>} : vector<48x128xbf16>, vector<128x128xbf16>, vector<48x128xf32> -> vector<48x128xf32>
    %c0_9 = arith.constant 0 : index
    %c0_10 = arith.constant 0 : index
    %12 = vector.load %arg7[%c0_9, %c0_10] : memref<1x128xf32, #tpu.memory_space<vmem>>, vector<1x128xf32>
    %13 = vector.broadcast %12 : vector<1x128xf32> to vector<48x128xf32>
    %14 = arith.addf %11, %13 : vector<48x128xf32>
    %c0_11 = arith.constant 0 : index
    %c0_12 = arith.constant 0 : index
    %15 = vector.load %arg2[%c0_11, %c0_12] : memref<48x128xf32, #tpu.memory_space<vmem>>, vector<48x128xf32>
    %16 = arith.truncf %15 : vector<48x128xf32> to vector<48x128xbf16>
    %c0_13 = arith.constant 0 : index
    %c0_14 = arith.constant 0 : index
    %17 = vector.load %arg8[%c0_13, %c0_14] : memref<128x128xbf16, #tpu.memory_space<vmem>>, vector<128x128xbf16>
    %cst_15 = arith.constant dense<0.000000e+00> : vector<48x128xf32>
    %18 = tpu.matmul %16, %17, %cst_15 {dimension_numbers = #tpu.dot_dimension_numbers<[1], [0], [0], [1], [0, 0, 1, 1], [], []>} : vector<48x128xbf16>, vector<128x128xbf16>, vector<48x128xf32> -> vector<48x128xf32>
    %c0_16 = arith.constant 0 : index
    %c0_17 = arith.constant 0 : index
    %19 = vector.load %arg9[%c0_16, %c0_17] : memref<1x128xf32, #tpu.memory_space<vmem>>, vector<1x128xf32>
    %20 = vector.broadcast %19 : vector<1x128xf32> to vector<48x128xf32>
    %21 = arith.addf %18, %20 : vector<48x128xf32>
    %cst_18 = arith.constant 0.000000e+00 : f32
    %22 = vector.broadcast %cst_18 : f32 to vector<48x128xf32>
    %23 = arith.maximumf %21, %22 : vector<48x128xf32>
    %24 = arith.truncf %23 : vector<48x128xf32> to vector<48x128xbf16>
    %c0_19 = arith.constant 0 : index
    %c0_20 = arith.constant 0 : index
    %25 = vector.load %arg10[%c0_19, %c0_20] : memref<128x128xbf16, #tpu.memory_space<vmem>>, vector<128x128xbf16>
    %cst_21 = arith.constant dense<0.000000e+00> : vector<48x128xf32>
    %26 = tpu.matmul %24, %25, %cst_21 {dimension_numbers = #tpu.dot_dimension_numbers<[1], [0], [0], [1], [0, 0, 1, 1], [], []>} : vector<48x128xbf16>, vector<128x128xbf16>, vector<48x128xf32> -> vector<48x128xf32>
    %c0_22 = arith.constant 0 : index
    %c0_23 = arith.constant 0 : index
    %27 = vector.load %arg11[%c0_22, %c0_23] : memref<1x128xf32, #tpu.memory_space<vmem>>, vector<1x128xf32>
    %28 = vector.broadcast %27 : vector<1x128xf32> to vector<48x128xf32>
    %29 = arith.addf %26, %28 : vector<48x128xf32>
    %c0_24 = arith.constant 0 : index
    %c0_25 = arith.constant 0 : index
    %30 = vector.load %arg3[%c0_24, %c0_25] : memref<48x1xf32, #tpu.memory_space<vmem>>, vector<48x1xf32>
    %31 = arith.subf %14, %29 : vector<48x128xf32>
    %32 = vector.broadcast %30 : vector<48x1xf32> to vector<48x128xf32>
    %33 = arith.mulf %31, %32 : vector<48x128xf32>
    %34 = arith.mulf %33, %33 : vector<48x128xf32>
    %35 = vector.extract_strided_slice %34 {offsets = [0, 0], sizes = [8, 128], strides = [1, 1]} : vector<48x128xf32> to vector<8x128xf32>
    %36 = vector.extract_strided_slice %34 {offsets = [8, 0], sizes = [8, 128], strides = [1, 1]} : vector<48x128xf32> to vector<8x128xf32>
    %37 = arith.addf %35, %36 : vector<8x128xf32>
    %38 = vector.extract_strided_slice %34 {offsets = [16, 0], sizes = [8, 128], strides = [1, 1]} : vector<48x128xf32> to vector<8x128xf32>
    %39 = arith.addf %37, %38 : vector<8x128xf32>
    %40 = vector.extract_strided_slice %34 {offsets = [24, 0], sizes = [8, 128], strides = [1, 1]} : vector<48x128xf32> to vector<8x128xf32>
    %41 = arith.addf %39, %40 : vector<8x128xf32>
    %42 = vector.extract_strided_slice %34 {offsets = [32, 0], sizes = [8, 128], strides = [1, 1]} : vector<48x128xf32> to vector<8x128xf32>
    %43 = arith.addf %41, %42 : vector<8x128xf32>
    %44 = vector.extract_strided_slice %34 {offsets = [40, 0], sizes = [8, 128], strides = [1, 1]} : vector<48x128xf32> to vector<8x128xf32>
    %45 = arith.addf %43, %44 : vector<8x128xf32>
    %46 = vector.shape_cast %45 : vector<8x128xf32> to vector<1x8x128xf32>
    %c0_26 = arith.constant 0 : index
    %c0_27 = arith.constant 0 : index
    %c0_28 = arith.constant 0 : index
    %47 = vector.load %arg12[%c0_26, %c0_27, %c0_28] : memref<1x8x128xf32, #tpu.memory_space<vmem>>, vector<1x8x128xf32>
    tpu.vector_store %arg12[%c0_26, %c0_27, %c0_28], %46 {strides = array<i32>} : memref<1x8x128xf32, #tpu.memory_space<vmem>>, vector<1x8x128xf32>,
    return
  }
  func.func @transform_0(%arg0: i32) -> (i32, i32) {
    %c0_i32 = arith.constant 0 : i32
    %c0_i32_0 = arith.constant 0 : i32
    return %arg0, %c0_i32 : i32, i32
  }
  func.func @transform_1(%arg0: i32) -> (i32, i32) {
    %c0_i32 = arith.constant 0 : i32
    %c0_i32_0 = arith.constant 0 : i32
    return %arg0, %c0_i32 : i32, i32
  }
  func.func @transform_2(%arg0: i32) -> (i32, i32) {
    %c0_i32 = arith.constant 0 : i32
    %c0_i32_0 = arith.constant 0 : i32
    return %arg0, %c0_i32 : i32, i32
  }
  func.func @transform_3(%arg0: i32) -> (i32, i32) {
    %c0_i32 = arith.constant 0 : i32
    %c0_i32_0 = arith.constant 0 : i32
    %c0_i32_1 = arith.constant 0 : i32
    return %c0_i32, %c0_i32_0 : i32, i32
  }
  func.func @transform_4(%arg0: i32) -> (i32, i32) {
    %c0_i32 = arith.constant 0 : i32
    %c0_i32_0 = arith.constant 0 : i32
    %c0_i32_1 = arith.constant 0 : i32
    return %c0_i32, %c0_i32_0 : i32, i32
  }
  func.func @transform_5(%arg0: i32) -> (i32, i32) {
    %c0_i32 = arith.constant 0 : i32
    %c0_i32_0 = arith.constant 0 : i32
    %c0_i32_1 = arith.constant 0 : i32
    return %c0_i32, %c0_i32_0 : i32, i32
  }
  func.func @transform_6(%arg0: i32) -> (i32, i32) {
    %c0_i32 = arith.constant 0 : i32
    %c0_i32_0 = arith.constant 0 : i32
    %c0_i32_1 = arith.constant 0 : i32
    return %c0_i32, %c0_i32_0 : i32, i32
  }
  func.func @transform_7(%arg0: i32) -> (i32, i32) {
    %c0_i32 = arith.constant 0 : i32
    %c0_i32_0 = arith.constant 0 : i32
    %c0_i32_1 = arith.constant 0 : i32
    return %c0_i32, %c0_i32_0 : i32, i32
  }
  func.func @transform_8(%arg0: i32) -> (i32, i32) {
    %c0_i32 = arith.constant 0 : i32
    %c0_i32_0 = arith.constant 0 : i32
    %c0_i32_1 = arith.constant 0 : i32
    return %c0_i32, %c0_i32_0 : i32, i32
  }
  func.func @transform_9(%arg0: i32) -> (i32, i32) {
    %c0_i32 = arith.constant 0 : i32
    %c0_i32_0 = arith.constant 0 : i32
    %c0_i32_1 = arith.constant 0 : i32
    return %c0_i32, %c0_i32_0 : i32, i32
  }
  func.func @transform_10(%arg0: i32) -> (i32, i32) {
    %c0_i32 = arith.constant 0 : i32
    %c0_i32_0 = arith.constant 0 : i32
    %c0_i32_1 = arith.constant 0 : i32
    return %c0_i32, %c0_i32_0 : i32, i32
  }
  func.func @transform_11(%arg0: i32) -> (i32, i32, i32) {
    %c0_i32 = arith.constant 0 : i32
    %c0_i32_0 = arith.constant 0 : i32
    %c0_i32_1 = arith.constant 0 : i32
    return %arg0, %c0_i32, %c0_i32_0 : i32, i32, i32
  }
}

</mosaic_0001>

<bundles_post_ra>
// kernel: reasoner_aux_forward.1
= control target key start
LH: loop header
LB: loop body
LE: loop exit
PB: predicated region body
PF: predicated region fallthrough
CT: control target
= control target key end

     0   :  { %v674_v58 = vmov 0   ;;  %s900_s3 = inlined_call_operand.vmem [shape: bf16[128,128], index: 3, kind: input, shape index: {}]   ;;  %s901_s7 = inlined_call_operand.vmem [shape: bf16[128,128], index: 7, kind: input, shape index: {}]   ;;  %s902_s4 = inlined_call_operand.vmem [shape: f32[1,128], index: 4, kind: input, shape index: {}]   ;;  %s903_s0 = inlined_call_operand.vmem [shape: f32[48,128], index: 0, kind: input, shape index: {}]   ;;  %s904_s1 = inlined_call_operand.vmem [shape: f32[48,128], index: 1, kind: input, shape index: {}]   ;;  %s905_s5 = inlined_call_operand.vmem [shape: bf16[128,128], index: 5, kind: input, shape index: {}]   ;;  %s906_s9 = inlined_call_operand.vmem [shape: bf16[128,128], index: 9, kind: input, shape index: {}]   ;;  %s907_s8 = inlined_call_operand.vmem [shape: f32[1,128], index: 8, kind: input, shape index: {}]   ;;  %s908_s6 = inlined_call_operand.vmem [shape: f32[1,128], index: 6, kind: input, shape index: {}]   ;;  %s909_s2 = inlined_call_operand.vmem [shape: f32[48,1], index: 2, kind: input, shape index: {}]   ;;  %s910_s10 = inlined_call_operand.vmem [shape: f32[1,128], index: 10, kind: input, shape index: {}]   ;;  %s911_s11 = inlined_call_operand.vmem [shape: f32[1,8,128], index: 11, kind: output, shape index: {}]  }
   0x1   :  { %v641_v0 = vld [vmem:[%s900_s3 + $0x38] sm:$0xff]  ;;  %v640_v2 = vld [vmem:[%s900_s3 + $0x30] sm:$0xff]  ;;  %v639_v4 = vld [vmem:[%s900_s3 + $0x28] sm:$0xff]  ;;  %667 = vset.pattern.permute.xlu0 %v674_v58  ;;  %668 = vset.pattern.permute.xlu1 %v674_v58 }
   0x2   :  { %v657_v1 = vld [vmem:[%s901_s7 + $0x38] sm:$0xff]  ;;  %115 = vmatpush.bf16.msra.mxu0 %v641_v0  ;;  %v656_v3 = vld [vmem:[%s901_s7 + $0x30] sm:$0xff]  ;;  %v655_v5 = vld [vmem:[%s901_s7 + $0x28] sm:$0xff]  ;;  %669 = vset.pattern.permute.xlu2 %v674_v58 }
   0x3   :  { %317 = vmatpush.bf16.msra.mxu2 %v657_v1  ;;  %v638_v6 = vld [vmem:[%s900_s3 + $0x20] sm:$0xff]  ;;  %v637_v8 = vld [vmem:[%s900_s3 + $0x18] sm:$0xff]  ;;  %v636_v10 = vld [vmem:[%s900_s3 + $0x10] sm:$0xff] }
   0x4   :  { %v654_v7 = vld [vmem:[%s901_s7 + $0x20] sm:$0xff]  ;;  %v653_v9 = vld [vmem:[%s901_s7 + $0x18] sm:$0xff]  ;;  %v652_v11 = vld [vmem:[%s901_s7 + $0x10] sm:$0xff] }
   0x5   :  { %v635_v12 = vld [vmem:[%s900_s3 + $0x8] sm:$0xff]  ;;  %v634_v14 = vld [vmem:[%s900_s3] sm:$0xff]  ;;  %v649_v22 = vld [vmem:[%s905_s5 + $0x38] sm:$0xff] }
   0x6   :  { %116 = vmatpush.bf16.msra.mxu0 %v640_v2  ;;  %v651_v13 = vld [vmem:[%s901_s7 + $0x8] sm:$0xff]  ;;  %v650_v15 = vld [vmem:[%s901_s7] sm:$0xff]  ;;  %v665_v23 = vld [vmem:[%s906_s9 + $0x38] sm:$0xff]  ;;  %216 = vmatpush.bf16.msra.mxu1 %v649_v22 }
   0x7   :  { %318 = vmatpush.bf16.msra.mxu2 %v656_v3  ;;  %v38_v16 = vld [vmem:[%s903_s0] sm:$0xff]  ;;  %v39_v17 = vld [vmem:[%s903_s0 + $0x8] sm:$0xff]  ;;  %v648_v24 = vld [vmem:[%s905_s5 + $0x30] sm:$0xff]  ;;  %418 = vmatpush.bf16.msra.mxu3 %v665_v23 }
   0x8   :  { %v240_v18 = vld [vmem:[%s904_s1] sm:$0xff]  ;;  %v241_v19 = vld [vmem:[%s904_s1 + $0x8] sm:$0xff]  ;;  %v44_v20 = vpack.c.bf16 %v39_v17, %v38_v16  ;;  %v664_v25 = vld [vmem:[%s906_s9 + $0x30] sm:$0xff] }
   0x9   :  { %v246_v21 = vpack.c.bf16 %v241_v19, %v240_v18  ;;  %v647_v26 = vld [vmem:[%s905_s5 + $0x28] sm:$0xff]  ;;  %v40_v28 = vld [vmem:[%s903_s0 + $0x10] sm:$0xff]  ;;  %v41_v29 = vld [vmem:[%s903_s0 + $0x18] sm:$0xff] }
   0xa   :  { %117 = vmatpush.bf16.msra.mxu0 %v639_v4  ;;  %217 = vmatpush.bf16.msra.mxu1 %v648_v24  ;;  %v663_v27 = vld [vmem:[%s906_s9 + $0x28] sm:$0xff]  ;;  %v242_v30 = vld [vmem:[%s904_s1 + $0x10] sm:$0xff]  ;;  %v243_v31 = vld [vmem:[%s904_s1 + $0x18] sm:$0xff]  ;;  %v45_v33 = vpack.c.bf16 %v41_v29, %v40_v28 }
   0xb   :  { %319 = vmatpush.bf16.msra.mxu2 %v655_v5  ;;  %419 = vmatpush.bf16.msra.mxu3 %v664_v25  ;;  %v646_v32 = vld [vmem:[%s905_s5 + $0x20] sm:$0xff]  ;;  %v247_v34 = vpack.c.bf16 %v243_v31, %v242_v30  ;;  %v43_v36 = vld [vmem:[%s903_s0 + $0x28] sm:$0xff]  ;;  %v645_v41 = vld [vmem:[%s905_s5 + $0x18] sm:$0xff] }
   0xc   :  { %v42_v35 = vld [vmem:[%s903_s0 + $0x20] sm:$0xff]  ;;  %v245_v38 = vld [vmem:[%s904_s1 + $0x28] sm:$0xff]  ;;  %v644_v43 = vld [vmem:[%s905_s5 + $0x10] sm:$0xff] }
   0xd   :  { %v244_v37 = vld [vmem:[%s904_s1 + $0x20] sm:$0xff]  ;;  %v46_v39 = vpack.c.bf16 %v43_v36, %v42_v35  ;;  %v661_v44 = vld [vmem:[%s906_s9 + $0x18] sm:$0xff]  ;;  %v643_v45 = vld [vmem:[%s905_s5 + $0x8] sm:$0xff] }
   0xe   :  { %118 = vmatpush.bf16.msra.mxu0 %v638_v6  ;;  %218 = vmatpush.bf16.msra.mxu1 %v647_v26  ;;  %v248_v40 = vpack.c.bf16 %v245_v38, %v244_v37  ;;  %v662_v42 = vld [vmem:[%s906_s9 + $0x20] sm:$0xff]  ;;  %v660_v46 = vld [vmem:[%s906_s9 + $0x10] sm:$0xff]  ;;  %v659_v48 = vld [vmem:[%s906_s9 + $0x8] sm:$0xff] }
   0xf   :  { %320 = vmatpush.bf16.msra.mxu2 %v654_v7  ;;  %420 = vmatpush.bf16.msra.mxu3 %v663_v27  ;;  %v642_v47 = vld [vmem:[%s905_s5] sm:$0xff]  ;;  %v443_v4 = vld [vmem:[%s909_s2 + $0x8] sm:$0xff]  ;;  %v444_v7 = vld [vmem:[%s909_s2 + $0x10] sm:$0xff] }
  0x10   :  { %v658_v49 = vld [vmem:[%s906_s9] sm:$0xff]  ;;  %466 = vperm.xlu1 %668, %v444_v7  }
  0x11   :  { %v670_v51 = vld [vmem:[%s902_s4] ss:$0 sm:$0xff] }
  0x12   :  { %119 = vmatpush.bf16.msra.mxu0 %v637_v8  ;;  %219 = vmatpush.bf16.msra.mxu1 %v646_v32  ;;  %v671_v56 = vld [vmem:[%s907_s8] ss:$0 sm:$0xff] }
  0x13   :  { %321 = vmatpush.bf16.msra.mxu2 %v653_v9  ;;  %421 = vmatpush.bf16.msra.mxu3 %v662_v42  ;;  %v442_v59 = vld [vmem:[%s909_s2] sm:$0xff] }
  0x14   :  { %456 = vperm.xlu0 %667, %v442_v59   ;;  %v446_v8 = vld [vmem:[%s909_s2 + $0x20] sm:$0xff] }
  0x15   :  { %476 = vperm.xlu2 %669, %v446_v8  }
  0x16   :  { %120 = vmatpush.bf16.msra.mxu0 %v636_v10  ;;  %220 = vmatpush.bf16.msra.mxu1 %v645_v41 }
  0x17   :  { %322 = vmatpush.bf16.msra.mxu2 %v652_v11  ;;  %422 = vmatpush.bf16.msra.mxu3 %v661_v44 }
  0x1a   :  { %121 = vmatpush.bf16.msra.mxu0 %v635_v12  ;;  %221 = vmatpush.bf16.msra.mxu1 %v644_v43 }
  0x1b   :  { %323 = vmatpush.bf16.msra.mxu2 %v651_v13  ;;  %423 = vmatpush.bf16.msra.mxu3 %v660_v46 }
  0x1c   :  { %461 = vperm.xlu0 %667, %v443_v4  }
  0x1e   :  { %122 = vmatpush.bf16.msra.mxu0 %v634_v14  ;;  %222 = vmatpush.bf16.msra.mxu1 %v643_v45  ;;  %v445_v14 = vld [vmem:[%s909_s2 + $0x18] sm:$0xff]  ;;  %v673_v45 = vld [vmem:[%s910_s10] ss:$0 sm:$0xff] }
  0x1f   :  { %324 = vmatpush.bf16.msra.mxu2 %v650_v15  ;;  %424 = vmatpush.bf16.msra.mxu3 %v659_v48  ;;  %v447_v15 = vld [vmem:[%s909_s2 + $0x28] sm:$0xff]  ;;  %v672_v48 = vld [vmem:[%s908_s6] ss:$0 sm:$0xff] }
  0x20   :  { %471 = vperm.xlu1 %668, %v445_v14   ;;  %481 = vperm.xlu2 %669, %v447_v15  }
  0x21   :  { %123 = vmatmul.bf16.vlgmr.msra.gmra.mxu0 %v44_v20 }
  0x22   :  { %325 = vmatmul.bf16.vlgmr.msra.gmra.mxu2 %v246_v21  ;;  %223 = vmatpush.bf16.msra.mxu1 %v642_v47 }
  0x23   :  { %425 = vmatpush.bf16.msra.mxu3 %v658_v49 }
  0x31   :  { %128 = vmatmul.bf16.gmra.mxu0 %v45_v33 }
  0x32   :  { %330 = vmatmul.bf16.gmra.mxu2 %v247_v34 }
  0x41   :  { %133 = vmatmul.bf16.gmra.mxu0 %v46_v39 }
  0x42   :  { %335 = vmatmul.bf16.gmra.mxu2 %v248_v40 }
  0x82   :  { %v467_v46 = vpop.permute.xlu1 %466 }
  0x86   :  { %v457_v44 = vpop.permute.xlu0 %456 }
  0x8e   :  { %v462_v58 = vpop.permute.xlu0 %461 }
  0x92   :  { %v472_v4 = vpop.permute.xlu1 %471 }
  0x9e   :  { %v124_v50 = vpop.f32.mrf.mxu0 }
  0x9f   :  { %v125_v52 = vadd.f32 %v670_v51, %v124_v50 }
  0xa1   :  { %v139_v55 = vmax.f32 %v125_v52, 0.0 }
  0xa5   :  { %v326_v53 = vpop.f32.mrf.mxu2 }
  0xa6   :  { %v126_v54 = vpop.f32.mrf.mxu0  ;;  %v327_v61 = vadd.f32 %v671_v56, %v326_v53 }
  0xa7   :  { %v127_v57 = vadd.f32 %v670_v51, %v126_v54 }
  0xa8   :  { %v341_v2 = vmax.f32 %v327_v61, 0.0 }
  0xa9   :  { %v140_v60 = vmax.f32 %v127_v57, 0.0 }
  0xab   :  { %v145_v62 = vpack.c.bf16 %v140_v60, %v139_v55 }
  0xad   :  { %v328_v63 = vpop.f32.mrf.mxu2  ;;  %224 = vmatmul.bf16.vlgmr.msra.gmra.mxu1 %v145_v62 }
  0xae   :  { %v329_v0 = vadd.f32 %v671_v56, %v328_v63  ;;  %v129_v1 = vpop.f32.mrf.mxu0 }
  0xaf   :  { %v130_v6 = vadd.f32 %v670_v51, %v129_v1 }
  0xb0   :  { %v342_v3 = vmax.f32 %v329_v0, 0.0 }
  0xb1   :  { %v141_v11 = vmax.f32 %v130_v6, 0.0 }
  0xb2   :  { %v347_v5 = vpack.c.bf16 %v342_v3, %v341_v2  ;;  %v477_v3 = vpop.permute.xlu2 %476 }
  0xb4   :  { %426 = vmatmul.bf16.vlgmr.msra.gmra.mxu3 %v347_v5 }
  0xb5   :  { %v331_v9 = vpop.f32.mrf.mxu2 }
  0xb6   :  { %v131_v10 = vpop.f32.mrf.mxu0  ;;  %v332_v16 = vadd.f32 %v671_v56, %v331_v9 }
  0xb7   :  { %v132_v12 = vadd.f32 %v670_v51, %v131_v10 }
  0xb8   :  { %v343_v21 = vmax.f32 %v332_v16, 0.0 }
  0xb9   :  { %v142_v13 = vmax.f32 %v132_v12, 0.0 }
  0xbb   :  { %v146_v17 = vpack.c.bf16 %v142_v13, %v141_v11 }
  0xbd   :  { %v333_v18 = vpop.f32.mrf.mxu2  ;;  %229 = vmatmul.bf16.gmra.mxu1 %v146_v17 }
  0xbe   :  { %v334_v19 = vadd.f32 %v671_v56, %v333_v18  ;;  %v134_v20 = vpop.f32.mrf.mxu0 }
  0xbf   :  { %v135_v24 = vadd.f32 %v670_v51, %v134_v20 }
  0xc0   :  { %v344_v22 = vmax.f32 %v334_v19, 0.0 }
  0xc1   :  { %v143_v27 = vmax.f32 %v135_v24, 0.0 }
  0xc2   :  { %v348_v23 = vpack.c.bf16 %v344_v22, %v343_v21  ;;  %v482_v22 = vpop.permute.xlu2 %481 }
  0xc4   :  { %431 = vmatmul.bf16.gmra.mxu3 %v348_v23 }
  0xc5   :  { %v336_v25 = vpop.f32.mrf.mxu2 }
  0xc6   :  { %v136_v26 = vpop.f32.mrf.mxu0  ;;  %v337_v30 = vadd.f32 %v671_v56, %v336_v25 }
  0xc7   :  { %v137_v28 = vadd.f32 %v670_v51, %v136_v26 }
  0xc8   :  { %v345_v34 = vmax.f32 %v337_v30, 0.0 }
  0xc9   :  { %v144_v29 = vmax.f32 %v137_v28, 0.0 }
  0xcb   :  { %v147_v31 = vpack.c.bf16 %v144_v29, %v143_v27 }
  0xcd   :  { %v338_v32 = vpop.f32.mrf.mxu2  ;;  %234 = vmatmul.bf16.gmra.mxu1 %v147_v31 }
  0xce   :  { %v339_v33 = vadd.f32 %v671_v56, %v338_v32 }
  0xd0   :  { %v346_v35 = vmax.f32 %v339_v33, 0.0 }
  0xd2   :  { %v349_v36 = vpack.c.bf16 %v346_v35, %v345_v34 }
  0xd4   :  { %436 = vmatmul.bf16.gmra.mxu3 %v349_v36 }
 0x12a   :  { %v225_v37 = vpop.f32.mrf.mxu1 }
 0x12b   :  { %v226_v54 = vadd.f32 %v672_v48, %v225_v37 }
 0x132   :  { %v227_v38 = vpop.f32.mrf.mxu1 }
 0x133   :  { %v228_v50 = vadd.f32 %v672_v48, %v227_v38 }
 0x137   :  { %v427_v39 = vpop.f32.mrf.mxu3 }
 0x138   :  { %v428_v51 = vadd.f32 %v673_v45, %v427_v39 }
 0x13a   :  { %v230_v40 = vpop.f32.mrf.mxu1  ;;  %v448_v59 = vsub.f32 %v226_v54, %v428_v51 }
 0x13b   :  { %v231_v55 = vadd.f32 %v672_v48, %v230_v40 }
 0x13c   :  { %v484_v5 = vmul.f32 %v457_v44, %v448_v59 }
 0x13e   :  { %v490_v11 = vmul.f32 %v484_v5, %v484_v5 }
 0x13f   :  { %v429_v41 = vpop.f32.mrf.mxu3 }
 0x140   :  { %v430_v49 = vadd.f32 %v673_v45, %v429_v41 }
 0x142   :  { %v232_v43 = vpop.f32.mrf.mxu1  ;;  %v449_v56 = vsub.f32 %v228_v50, %v430_v49 }
 0x143   :  { %v233_v60 = vadd.f32 %v672_v48, %v232_v43 }
 0x144   :  { %v485_v63 = vmul.f32 %v462_v58, %v449_v56 }
 0x146   :  { %v491_v8 = vmul.f32 %v485_v63, %v485_v63 }
 0x147   :  { %v432_v42 = vpop.f32.mrf.mxu3 }
 0x148   :  { %v433_v52 = vadd.f32 %v673_v45, %v432_v42  ;;  %v496_v15 = vadd.f32 %v491_v8, %v490_v11 }
 0x14a   :  { %v235_v53 = vpop.f32.mrf.mxu1  ;;  %v450_v61 = vsub.f32 %v231_v55, %v433_v52 }
 0x14b   :  { %v236_v0 = vadd.f32 %v672_v48, %v235_v53 }
 0x14c   :  { %v486_v6 = vmul.f32 %v467_v46, %v450_v61 }
 0x14e   :  { %v492_v12 = vmul.f32 %v486_v6, %v486_v6 }
 0x14f   :  { %v434_v47 = vpop.f32.mrf.mxu3 }
 0x150   :  { %v435_v57 = vadd.f32 %v673_v45, %v434_v47  ;;  %v497_v19 = vadd.f32 %v496_v15, %v492_v12 }
 0x152   :  { %v451_v1 = vsub.f32 %v233_v60, %v435_v57  ;;  %v237_v10 = vpop.f32.mrf.mxu1 }
 0x153   :  { %v238_v17 = vadd.f32 %v672_v48, %v237_v10 }
 0x154   :  { %v487_v9 = vmul.f32 %v472_v4, %v451_v1 }
 0x156   :  { %v493_v16 = vmul.f32 %v487_v9, %v487_v9 }
 0x157   :  { %v437_v62 = vpop.f32.mrf.mxu3 }
 0x158   :  { %v438_v2 = vadd.f32 %v673_v45, %v437_v62  ;;  %v498_v23 = vadd.f32 %v497_v19, %v493_v16 }
 0x15a   :  { %v452_v7 = vsub.f32 %v236_v0, %v438_v2 }
 0x15c   :  { %v488_v13 = vmul.f32 %v477_v3, %v452_v7 }
 0x15e   :  { %v494_v20 = vmul.f32 %v488_v13, %v488_v13 }
 0x15f   :  { %v439_v14 = vpop.f32.mrf.mxu3 }
 0x160   :  { %v440_v18 = vadd.f32 %v673_v45, %v439_v14  ;;  %v499_v25 = vadd.f32 %v498_v23, %v494_v20 }
 0x162   :  { %v453_v21 = vsub.f32 %v238_v17, %v440_v18 }
 0x164   :  { %v489_v24 = vmul.f32 %v482_v22, %v453_v21 }
 0x166   :  { %v495_v26 = vmul.f32 %v489_v24, %v489_v24 }
 0x168   :  { %v500_v27 = vadd.f32 %v499_v25, %v495_v26 }
 0x16a   :  { %501 = vst [vmem:[%s911_s11] sm:$0xff] %v500_v27 }

</bundles_post_ra>
